<compile_context>
chip_gen: v6e
topology: v6e:2x2x1
jax: 0.10.0
libtpu: 0.0.40
codegen_flags: <defaults>
</compile_context>

<pallas_src>
import jax
import jax.numpy as jnp
from jax.experimental import pallas as pl
from jax.experimental.pallas import tpu as pltpu


# Below this size a pallas_call launch costs more than a fused XLA copy.
_SMALL_COPY_BYTES = 256 * 1024


def _dma_copy_kernel(x_hbm, o_hbm, sem):
    # Whole-array HBM->HBM DMA: zero compute, no VMEM staging, roofline copy.
    cp = pltpu.make_async_copy(x_hbm, o_hbm, sem)
    cp.start()
    cp.wait()


def _dma_identity_copy(x):
    """Identity copy of `x` into a fresh HBM buffer via a single DMA."""
    return pl.pallas_call(
        _dma_copy_kernel,
        out_shape=jax.ShapeDtypeStruct(x.shape, x.dtype),
        in_specs=[pl.BlockSpec(memory_space=pl.ANY)],
        out_specs=pl.BlockSpec(memory_space=pl.ANY),
        scratch_shapes=[pltpu.SemaphoreType.DMA(())],
    )(x)


def identity_embedding_forward(x, device=None, materialize=False,
                               force_kernel=False):
    """JAX equivalent of IdentityEmbedding.forward(x) -> (x, None, None).

    Default path is a zero-cost pass-through (exactly like the nn.Module,
    which returns the same tensor object).  `materialize=True` returns a
    fresh buffer via a single whole-array HBM->HBM DMA Pallas kernel (or a
    plain XLA copy for tiny / empty tensors, unless `force_kernel=True`).
    """
    if not materialize:
        return (x, None, None)

    if x.size == 0:
        # Fresh (empty) buffer to keep the materialize contract consistent.
        return (jnp.copy(x), None, None)

    nbytes = x.size * jnp.dtype(x.dtype).itemsize
    if nbytes < _SMALL_COPY_BYTES and not force_kernel:
        # Kernel-launch overhead dominates at this size; let XLA fuse a copy.
        return (jnp.copy(x), None, None)

    return (_dma_identity_copy(x), None, None)


if __name__ == "__main__":
    key = jax.random.PRNGKey(0)
    # Small NCHW-style input consistent with a typical embedding-module caller.
    x = jax.random.normal(key, (2, 4, 16, 16), dtype=jnp.float32)

    # Hot path: pure pass-through — no kernel, no HBM traffic.
    out, aux1, aux2 = identity_embedding_forward(x)
    assert out is x and aux1 is None and aux2 is None

    # Kernel path: single whole-array HBM->HBM DMA identity copy
    # (force_kernel so the Pallas kernel actually runs on this small input).
    out_k, aux1_k, aux2_k = identity_embedding_forward(
        x, materialize=True, force_kernel=True)
    out_k = jax.block_until_ready(out_k)

    assert aux1_k is None and aux2_k is None
    assert out_k.shape == x.shape and out_k.dtype == x.dtype
    assert bool(jnp.all(out_k == x))

    # Small-size fast path (plain XLA copy) stays correct too.
    out_s, _, _ = identity_embedding_forward(x, materialize=True)
    assert bool(jnp.all(jax.block_until_ready(out_s) == x))

    print("KERNEL_OK")
</pallas_src>

<mosaic_0001>
module attributes {stable_mosaic.version = 11 : i64} {
  func.func @_dma_copy_kernel(%arg0: memref<2x4x16x16xf32, #tpu.memory_space<any>>, %arg1: memref<2x4x16x16xf32, #tpu.memory_space<any>>, %arg2: memref<!tpu.dma_semaphore, #tpu.memory_space<semaphore_mem>>) attributes {dimension_semantics = [], scalar_prefetch = 0 : i64, scratch_operands = 1 : i64, tpu.core_type = #tpu.core_type<tc>} {
    tpu.enqueue_dma source(%arg0 : memref<2x4x16x16xf32, #tpu.memory_space<any>>) target(%arg1 : memref<2x4x16x16xf32, #tpu.memory_space<any>>) target_semaphore(%arg2 : memref<!tpu.dma_semaphore, #tpu.memory_space<semaphore_mem>>)
    tpu.wait_dma2 semaphore(%arg2 : memref<!tpu.dma_semaphore, #tpu.memory_space<semaphore_mem>>) src(%arg0 : memref<2x4x16x16xf32, #tpu.memory_space<any>>) dst(%arg1 : memref<2x4x16x16xf32, #tpu.memory_space<any>>)
    return
  }
}

</mosaic_0001>

<bundles_post_ra>
// kernel: tpu_custom_call.1
= control target key start
LH: loop header
LB: loop body
LE: loop exit
PB: predicated region body
PF: predicated region fallthrough
CT: control target
= control target key end

     0   :  { %s30_s6 = smov [#allocation2]   ;;  %s31_s7 = smov 131072   ;;  %s49_s0 = inlined_call_operand.hbm [shape: f32[2,4,16,16], index: 0, kind: input, shape index: {}]   ;;  %s50_s1 = inlined_call_operand.hbm [shape: f32[2,4,16,16], index: 1, kind: output, shape index: {}]  }
   0x1   :  { %s32_s8 = smov 0  }
   0x2   :  { %12 = dma.general %s49_s0, 2048, %s50_s1, %s30_s6, %s31_s7, [#allocation4], %s32_s8, 0  }
   0x3   :  { %28 = dma.done.wait [#allocation2], 2048 }
   0x4   :  { %29 = vsyncadd [#allocation2], 4294965248 }
   0x5   :  { %18 = vsyncmov [#allocation2] }
   0x8   :  { %s19_s13 = vpop.sfrf %18 }
   0x9   :  { %p24_p0 = scmp.ne.s32.totalorder %s19_s13, 0 }
   0xb   :  { %23 = shalt.err (%p24_p0)  }

</bundles_post_ra>
